<compile_context>
chip_gen: v7x
topology: tpu7x:2x2x1
jax: 0.10.0
libtpu: 0.0.40
codegen_flags: <defaults>
</compile_context>

<pallas_src>
import jax
import jax.numpy as jnp
from jax.experimental import pallas as pl
from jax.experimental.pallas import tpu as pltpu


def _fusion2_kernel(x1_ref, x2_ref, w1_ref, w2_ref, o_ref):
    # x1_ref, x2_ref: (1, C, tl)   w1_ref, w2_ref: (C, C)   o_ref: (1, C, tl)
    x1 = jnp.maximum(x1_ref[0], jnp.zeros((), x1_ref.dtype))  # ReLU
    x2 = jnp.maximum(x2_ref[0], jnp.zeros((), x2_ref.dtype))
    acc = jnp.dot(w1_ref[...], x1, preferred_element_type=jnp.float32)
    acc = acc + jnp.dot(w2_ref[...], x2, preferred_element_type=jnp.float32)
    o_ref[0] = acc.astype(o_ref.dtype)


def _fusion_bias_kernel(x1_ref, w1_ref, b_ref, o_ref):
    # x1_ref: (1, C, tl)   w1_ref: (C, C)   b_ref: (1, C, 1)   o_ref: (1, C, tl)
    x1 = jnp.maximum(x1_ref[0], jnp.zeros((), x1_ref.dtype))  # ReLU
    acc = jnp.dot(w1_ref[...], x1, preferred_element_type=jnp.float32)
    acc = acc + b_ref[0]  # (C, 1) broadcasts across the lane (spatial) axis
    o_ref[0] = acc.astype(o_ref.dtype)


def _vmem_capacity_bytes():
    try:
        return int(pltpu.get_tpu_info().vmem_capacity_bytes)
    except Exception:
        return 64 << 20  # conservative: v7x per-TensorCore VMEM


def _choose_spatial_tile(L, C, itemsize):
    """Pick a lane-dense spatial tile: multiple of 128, ~2 MiB per streamed block."""
    target_block_bytes = min(2 << 20, _vmem_capacity_bytes() // 16)
    tl = target_block_bytes // max(1, C * itemsize)
    tl = max(128, min(tl, 8192))
    tl = (tl // 128) * 128
    lp = pl.cdiv(L, 128) * 128
    return min(tl, lp)


def fusion_conv(x1, x2, weight, x2_mask=None, x2_proj=None):
    """FusionConv.forward: conv1x1(relu(cat([x1, x2], dim=1))), no bias.

    x1:     (B, C, H, W) float32 (NCHW, matching the PyTorch module)
    x2:     (B, C, H, W) or (B, C)  (the latter is broadcast over H, W)
    weight: (C, 2C) -- squeezed nn.Conv2d(2C, C, kernel_size=1, bias=False).weight
    returns (B, C, H, W)
    """
    # TODO(synk): x2_proj (arbitrary projection module) and x2_mask are not
    # modeled here; pass a pre-projected x2 if needed.
    B, C, H, W = x1.shape
    assert weight.shape == (C, 2 * C)
    dtype = x1.dtype
    itemsize = jnp.dtype(dtype).itemsize

    L = H * W
    tl = _choose_spatial_tile(L, C, itemsize)
    Lp = pl.cdiv(L, tl) * tl
    n_l = Lp // tl

    w1 = weight[:, :C]   # (C, C) acts on the x1 channels
    w2 = weight[:, C:]   # (C, C) acts on the x2 channels

    x1f = x1.reshape(B, C, L)                      # free reshape (NCHW contiguous)
    if Lp != L:
        x1f = jnp.pad(x1f, ((0, 0), (0, 0), (0, Lp - L)))

    cparams = pltpu.CompilerParams(
        dimension_semantics=("parallel", "parallel"),
        vmem_limit_bytes=32 << 20,
    )

    if x2.ndim == x1.ndim:
        assert x2.shape == x1.shape
        x2f = x2.reshape(B, C, L)
        if Lp != L:
            x2f = jnp.pad(x2f, ((0, 0), (0, 0), (0, Lp - L)))

        cost = pl.CostEstimate(
            flops=4 * B * Lp * C * C,
            transcendentals=0,
            bytes_accessed=(3 * B * C * Lp + 2 * C * C) * itemsize,
        )
        out = pl.pallas_call(
            _fusion2_kernel,
            out_shape=jax.ShapeDtypeStruct((B, C, Lp), dtype),
            grid_spec=pltpu.PrefetchScalarGridSpec(
                num_scalar_prefetch=0,
                grid=(B, n_l),
                in_specs=[
                    pl.BlockSpec((1, C, tl), lambda b, l: (b, 0, l)),
                    pl.BlockSpec((1, C, tl), lambda b, l: (b, 0, l)),
                    pl.BlockSpec((C, C), lambda b, l: (0, 0)),
                    pl.BlockSpec((C, C), lambda b, l: (0, 0)),
                ],
                out_specs=pl.BlockSpec((1, C, tl), lambda b, l: (b, 0, l)),
            ),
            compiler_params=cparams,
            cost_estimate=cost,
        )(x1f, x2f, w1, w2)
    else:
        # tile_x2 path: x2 is (B, C).  Its conv contribution is spatially
        # constant -> fold it into a per-batch bias instead of broadcasting a
        # full (B, C, H, W) tensor through HBM.
        assert x2.shape == (B, C)
        bias = jnp.dot(jnp.maximum(x2, 0).astype(jnp.float32),
                       w2.T.astype(jnp.float32))           # (B, C)
        bias = bias.reshape(B, C, 1).astype(jnp.float32)

        cost = pl.CostEstimate(
            flops=2 * B * Lp * C * C,
            transcendentals=0,
            bytes_accessed=(2 * B * C * Lp + C * C) * itemsize + B * C * 4,
        )
        out = pl.pallas_call(
            _fusion_bias_kernel,
            out_shape=jax.ShapeDtypeStruct((B, C, Lp), dtype),
            grid_spec=pltpu.PrefetchScalarGridSpec(
                num_scalar_prefetch=0,
                grid=(B, n_l),
                in_specs=[
                    pl.BlockSpec((1, C, tl), lambda b, l: (b, 0, l)),
                    pl.BlockSpec((C, C), lambda b, l: (0, 0)),
                    pl.BlockSpec((1, C, 1), lambda b, l: (b, 0, 0)),
                ],
                out_specs=pl.BlockSpec((1, C, tl), lambda b, l: (b, 0, l)),
            ),
            compiler_params=cparams,
            cost_estimate=cost,
        )(x1f, w1, bias)

    if Lp != L:
        out = out[:, :, :L]
    return out.reshape(B, C, H, W)


if __name__ == "__main__":
    key = jax.random.PRNGKey(0)
    k1, k2, k3, kw = jax.random.split(key, 4)

    B, C, H, W = 2, 4, 16, 16
    x1 = jax.random.normal(k1, (B, C, H, W), dtype=jnp.float32)
    x2 = jax.random.normal(k2, (B, C, H, W), dtype=jnp.float32)
    x2_vec = jax.random.normal(k3, (B, C), dtype=jnp.float32)
    # Conv2d(2C, C, kernel_size=1, bias=False) weight, squeezed to (C, 2C)
    weight = jax.random.normal(kw, (C, 2 * C), dtype=jnp.float32) * 0.1

    # --- main path: 4D x2 (cat -> relu -> 1x1 conv) ---
    y = jax.block_until_ready(fusion_conv(x1, x2, weight))
    xcat = jnp.concatenate([x1, x2], axis=1)
    ref = jnp.einsum("oc,bchw->bohw", weight, jnp.maximum(xcat, 0.0))
    assert y.shape == (B, C, H, W)
    assert jnp.allclose(y, ref, atol=1e-4, rtol=1e-4), float(jnp.max(jnp.abs(y - ref)))

    # --- tile_x2 path: (B, C) x2 broadcast over spatial, folded into a bias ---
    y2 = jax.block_until_ready(fusion_conv(x1, x2_vec, weight))
    x2b = jnp.broadcast_to(x2_vec[:, :, None, None], (B, C, H, W))
    ref2 = jnp.einsum("oc,bchw->bohw", weight,
                      jnp.maximum(jnp.concatenate([x1, x2b], axis=1), 0.0))
    assert y2.shape == (B, C, H, W)
    assert jnp.allclose(y2, ref2, atol=1e-4, rtol=1e-4), float(jnp.max(jnp.abs(y2 - ref2)))

    print("KERNEL_OK")
</pallas_src>

<mosaic_0001>
module attributes {stable_mosaic.version = 11 : i64} {
  func.func @_fusion2_kernel(%arg0: i32, %arg1: i32, %arg2: memref<1x4x256xf32, #tpu.memory_space<vmem>>, %arg3: memref<1x4x256xf32, #tpu.memory_space<vmem>>, %arg4: memref<4x4xf32, #tpu.memory_space<vmem>>, %arg5: memref<4x4xf32, #tpu.memory_space<vmem>>, %arg6: memref<1x4x256xf32, #tpu.memory_space<vmem>>) attributes {dimension_semantics = [#tpu.dimension_semantics<parallel>, #tpu.dimension_semantics<parallel>], iteration_bounds = array<i64: 2, 1>, scalar_prefetch = 0 : i64, scratch_operands = 0 : i64, tpu.core_type = #tpu.core_type<tc>, window_params = [{transform_indices = @transform_0, window_bounds = array<i64: 1, 4, 256>}, {transform_indices = @transform_1, window_bounds = array<i64: 1, 4, 256>}, {pipeline_mode = #tpu.pipeline_mode<synchronous>, transform_indices = @transform_2, window_bounds = array<i64: 4, 4>}, {pipeline_mode = #tpu.pipeline_mode<synchronous>, transform_indices = @transform_3, window_bounds = array<i64: 4, 4>}, {transform_indices = @transform_4, window_bounds = array<i64: 1, 4, 256>}]} {
    %c0 = arith.constant 0 : index
    %c0_0 = arith.constant 0 : index
    %c0_1 = arith.constant 0 : index
    %0 = vector.load %arg2[%c0, %c0_0, %c0_1] : memref<1x4x256xf32, #tpu.memory_space<vmem>>, vector<1x4x256xf32>
    %1 = vector.shape_cast %0 : vector<1x4x256xf32> to vector<4x256xf32>
    %cst = arith.constant 0.000000e+00 : f32
    %2 = vector.broadcast %cst : f32 to vector<4x256xf32>
    %3 = arith.maximumf %1, %2 : vector<4x256xf32>
    %c0_2 = arith.constant 0 : index
    %c0_3 = arith.constant 0 : index
    %c0_4 = arith.constant 0 : index
    %4 = vector.load %arg3[%c0_2, %c0_3, %c0_4] : memref<1x4x256xf32, #tpu.memory_space<vmem>>, vector<1x4x256xf32>
    %5 = vector.shape_cast %4 : vector<1x4x256xf32> to vector<4x256xf32>
    %cst_5 = arith.constant 0.000000e+00 : f32
    %6 = vector.broadcast %cst_5 : f32 to vector<4x256xf32>
    %7 = arith.maximumf %5, %6 : vector<4x256xf32>
    %c0_6 = arith.constant 0 : index
    %c0_7 = arith.constant 0 : index
    %8 = vector.load %arg4[%c0_6, %c0_7] : memref<4x4xf32, #tpu.memory_space<vmem>>, vector<4x4xf32>
    %cst_8 = arith.constant dense<0.000000e+00> : vector<4x256xf32>
    %9 = tpu.matmul %8, %3, %cst_8 {dimension_numbers = #tpu.dot_dimension_numbers<[1], [0], [0], [1], [0, 0, 1, 1], [], []>} : vector<4x4xf32>, vector<4x256xf32>, vector<4x256xf32> -> vector<4x256xf32>
    %c0_9 = arith.constant 0 : index
    %c0_10 = arith.constant 0 : index
    %10 = vector.load %arg5[%c0_9, %c0_10] : memref<4x4xf32, #tpu.memory_space<vmem>>, vector<4x4xf32>
    %cst_11 = arith.constant dense<0.000000e+00> : vector<4x256xf32>
    %11 = tpu.matmul %10, %7, %cst_11 {dimension_numbers = #tpu.dot_dimension_numbers<[1], [0], [0], [1], [0, 0, 1, 1], [], []>} : vector<4x4xf32>, vector<4x256xf32>, vector<4x256xf32> -> vector<4x256xf32>
    %12 = arith.addf %9, %11 : vector<4x256xf32>
    %c0_12 = arith.constant 0 : index
    %c0_13 = arith.constant 0 : index
    %c0_14 = arith.constant 0 : index
    %13 = vector.load %arg6[%c0_12, %c0_13, %c0_14] : memref<1x4x256xf32, #tpu.memory_space<vmem>>, vector<1x4x256xf32>
    %14 = vector.shape_cast %13 : vector<1x4x256xf32> to vector<4x256xf32>
    %15 = vector.shape_cast %12 : vector<4x256xf32> to vector<1x4x256xf32>
    tpu.vector_store %arg6[%c0_12, %c0_13, %c0_14], %15 {strides = array<i32>} : memref<1x4x256xf32, #tpu.memory_space<vmem>>, vector<1x4x256xf32>,
    return
  }
  func.func @transform_0(%arg0: i32, %arg1: i32) -> (i32, i32, i32) {
    %c0_i32 = arith.constant 0 : i32
    %c0_i32_0 = arith.constant 0 : i32
    return %arg0, %c0_i32, %arg1 : i32, i32, i32
  }
  func.func @transform_1(%arg0: i32, %arg1: i32) -> (i32, i32, i32) {
    %c0_i32 = arith.constant 0 : i32
    %c0_i32_0 = arith.constant 0 : i32
    return %arg0, %c0_i32, %arg1 : i32, i32, i32
  }
  func.func @transform_2(%arg0: i32, %arg1: i32) -> (i32, i32) {
    %c0_i32 = arith.constant 0 : i32
    %c0_i32_0 = arith.constant 0 : i32
    %c0_i32_1 = arith.constant 0 : i32
    return %c0_i32, %c0_i32_0 : i32, i32
  }
  func.func @transform_3(%arg0: i32, %arg1: i32) -> (i32, i32) {
    %c0_i32 = arith.constant 0 : i32
    %c0_i32_0 = arith.constant 0 : i32
    %c0_i32_1 = arith.constant 0 : i32
    return %c0_i32, %c0_i32_0 : i32, i32
  }
  func.func @transform_4(%arg0: i32, %arg1: i32) -> (i32, i32, i32) {
    %c0_i32 = arith.constant 0 : i32
    %c0_i32_0 = arith.constant 0 : i32
    return %arg0, %c0_i32, %arg1 : i32, i32, i32
  }
}

</mosaic_0001>

<bundles_post_ra>
// kernel: tpu_custom_call.1
= control target key start
LH: loop header
LB: loop body
LE: loop exit
PB: predicated region body
PF: predicated region fallthrough
CT: control target
= control target key end

     0   :  { %9 = vsyncpa [#allocation3], 0  ;;  %s1083_s0 = inlined_call_operand.hbm [shape: f32[2,4,256], index: 0, kind: input, shape index: {}]   ;;  %s1084_s1 = inlined_call_operand.hbm [shape: f32[2,4,256], index: 1, kind: input, shape index: {}]   ;;  %s1085_s2 = inlined_call_operand.vmem [shape: f32[4,4], index: 2, kind: input, shape index: {}]   ;;  %s1086_s3 = inlined_call_operand.vmem [shape: f32[4,4], index: 3, kind: input, shape index: {}]   ;;  %s1087_s4 = inlined_call_operand.hbm [shape: f32[2,4,256], index: 4, kind: output, shape index: {}]  }
   0x1   :  { %11 = vsyncpa [#allocation3 + $0x1], 0 }
   0x2   :  { %12 = vsyncpa [#allocation6], 0 }
   0x3   :  { %14 = vsyncpa [#allocation6 + $0x1], 0 }
   0x4   :  { %15 = vsyncpa [#allocation4], 0 }
   0x5   :  { %17 = vsyncpa [#allocation4 + $0x1], 0  ;;  %s852_s15 = smov 0   ;;  %s854_s16 = smov 0  }
   0x6   :  { %s856_s17 = smov 0   ;;  %s858_s18 = smov 0  }
   0x7   :  { %s860_s19 = smov 0   ;;  %s862_s20 = smov 0  }
   0x8 LB: > { %s577_s21 = sadd.s32 4294967295, %s821_s20   ;;  %s578_s22 = sadd.s32 4294967294, %s821_s20   ;;  %s821_s20 = sphi %s862_s20, %s23_s20   ;;  %s817_s19 = sphi %s860_s19, %s1107_s19   ;;  %s813_s18 = sphi %s858_s18, %s1106_s18   ;;  %s809_s17 = sphi %s856_s17, %s1105_s17   ;;  %s805_s16 = sphi %s854_s16, %s1104_s16   ;;  %s801_s15 = sphi %s852_s15, %s1103_s15  }
   0x9   : > { %s35_s23 = sadd.s32 1, %s817_s19  ;;  %s44_s24 = sadd.s32 1, %s809_s17 }
   0xa   : > { %p37_p0 = scmp.ge.s32.totalorder %s35_s23, 2  ;;  %p51_p1 = scmp.ne.s32.totalorder %s809_s17, %s805_s16 }
   0xb   : > { %p52_p2 = scmp.eq.s32.totalorder %s821_s20, 0  ;;  %p57_p3 = scmp.ne.s32.totalorder %s805_s16, %s801_s15 }
   0xc   : > { %s1109_s23 = smov (%p37_p0, %s35_s23), 0  ;;  %p58_p5 = scmp.eq.s32.totalorder %s577_s21, 0 }
   0xd   : > { %p893_p4 = por %p52_p2, %p51_p1  ;;  %s39_s26 = ssub.s32 %s817_s19, %s1109_s23 }
   0xe   : > { %p153_p6 = scmp.eq.s32.totalorder %s577_s21, 1  ;;  %p42_p7 = scmp.eq.s32.totalorder %s39_s26, 0 }
   0xf   : > { %p899_p8 = por %p58_p5, %p57_p3  ;;  %p159_p10 = scmp.eq.s32.totalorder %s578_s22, 1 }
  0x10   : > { %p903_p9 = por %p153_p6, %p51_p1  ;;  %p624_p13 = scmp.lt.s32.totalorder %s821_s20, 2 }
  0x11   : > { %s1091_s27 = scalar_select %p899_p8, 1, 0 }
  0x12   : > { %s1092_s28 = scalar_select %p903_p9, 1, 0 }
  0x13   : > { %s908_s29 = scalar_select %p42_p7, %s809_s17, %s44_s24  }
  0x14   : > { %p910_p11 = por %p159_p10, %p57_p3  ;;  %s917_s5 = sand.u32 1, %s809_s17  }
  0x15   : > { %s581_s6 = sshll.u32 %s917_s5, 3  ;;  %s602_s7 = sshll.u32 %s817_s19, 7 }
  0x16   : > { %s1093_s30 = scalar_select %p910_p11, 1, 0 }
  0x17   : > { %s926_s10 = scalar_lea.hbm %s1083_s0, %s602_s7  ;;  %s189_s11 = scalar_lea.vmem [#allocation2], %s581_s6 }
  0x18   : > { %s199_s12 = sshll.u32 %s189_s11, 4  ;;  %p934_p0 = pnand %p624_p13, %p893_p4  ;;  %s930_s12 = int_to_ptr.vmem [resolvable:$true] %s199_s12 }
  0x19   : > { %s186_s14 = scalar_lea.sflag [#allocation3], %s917_s5  ;;  %s675_s21 = scalar_lea.hbm %s926_s10, 128 }
  0x1a   : > { %p676_p3 = scmp.ne.s32.totalorder %s926_s10, %s675_s21  ;;  %p677_p5 = pneg %p934_p0 }
  0x1b   : > { %s680_s25 = scalar_lea.hbm %s1083_s0, 256  ;;  %p681_p4 = scmp.lt.u32.totalorder %s926_s10, %s1083_s0 }
  0x1c   : > { %p678_p6 = pnand %p677_p5, %p676_p3  ;;  %p682_p10 = scmp.lt.u32.totalorder %s680_s25, %s675_s21 }
  0x1d   : > { %p684_p12 = scmp.lt.u32.totalorder %s675_s21, %s926_s10 }
  0x1e   : > { %p679_p7 = pneg %p678_p6  ;;  %p683_p13 = por %p682_p10, %p681_p4 }
  0x20   : > { %p685_p1 = por %p684_p12, %p683_p13 }
  0x22   : > { %p686_p2 = pnand %p685_p1, %p679_p7 }
  0x24   : > { %689 = shalt.err (!%p686_p2)
}
  0x25   : > { %s690_s9 = scalar_lea.vmem %s930_s12, 128  ;;  %s823_s11 = smov [#allocation2]  }
  0x26   : > { %p691_p3 = scmp.ne.s32.totalorder %s930_s12, %s690_s9  ;;  %s695_s22 = sshll.u32 %s823_s11, 4  ;;  %s696_s22 = int_to_ptr.vmem [resolvable:$false] %s695_s22 }
  0x27   : > { %s697_s24 = scalar_lea.vmem %s696_s22, 256  ;;  %p698_p9 = scmp.lt.s32.totalorder %s930_s12, %s696_s22 }
  0x28   : > { %p693_p6 = pnand %p691_p3, %p677_p5  ;;  %p699_p4 = scmp.lt.s32.totalorder %s697_s24, %s690_s9 }
  0x2a   : > { %p694_p11 = pneg %p693_p6  ;;  %p700_p10 = por %p699_p4, %p698_p9 }
  0x2c   : > { %p701_p12 = pnand %p700_p10, %p694_p11 }
  0x2e   : > { %704 = shalt.err (!%p701_p12)
}
  0x2f   : > { %616 = dma.hbm_to_vmem [thread:$0]  (!%p934_p0), %s926_s10, 128, %s930_s12, %s186_s14  }
  0x30   : > { %p1095_p1 = scmp.lt.s32.totalorder %s821_s20, 3  ;;  %p1096_p2 = scmp.ge.s32.totalorder %s821_s20, 1 }
  0x31   : > { %s979_s8 = scalar_lea.hbm %s1084_s1, %s602_s7  ;;  %s210_s9 = scalar_lea.vmem [#allocation5], %s581_s6 }
  0x32   : > { %p970_p7 = pnand %p1096_p2, %p1095_p1  ;;  %s220_s11 = sshll.u32 %s210_s9, 4  ;;  %s221_s11 = int_to_ptr.vmem [resolvable:$true] %s220_s11 }
  0x33   : > { %s207_s10 = scalar_lea.sflag [#allocation6], %s917_s5  ;;  %s705_s12 = scalar_lea.hbm %s979_s8, 128 }
  0x34   : > { %s1097_s21 = scalar_select %p970_p7, 1, 0 }
  0x35   : > { %p706_p9 = scmp.ne.s32.totalorder %s979_s8, %s705_s12  ;;  %s710_s7 = scalar_lea.hbm %s1084_s1, 256 }
  0x36   : > { %p711_p3 = scmp.lt.u32.totalorder %s979_s8, %s1084_s1  ;;  %p712_p6 = scmp.lt.u32.totalorder %s710_s7, %s705_s12 }
  0x37   : > { %p708_p11 = pnand %p706_p9, %p677_p5  ;;  %p714_p10 = scmp.lt.u32.totalorder %s705_s12, %s979_s8 }
  0x38   : > { %p713_p4 = por %p712_p6, %p711_p3 }
  0x39   : > { %p709_p13 = pneg %p708_p11 }
  0x3a   : > { %p715_p12 = por %p714_p10, %p713_p4 }
  0x3c   : > { %p716_p1 = pnand %p715_p12, %p709_p13 }
  0x3e   : > { %719 = shalt.err (!%p716_p1)
}
  0x3f   : > { %s720_s5 = scalar_lea.vmem %s221_s11, 128  ;;  %s824_s6 = smov [#allocation5]  }
  0x40   : > { %p721_p2 = scmp.ne.s32.totalorder %s221_s11, %s720_s5  ;;  %s725_s26 = sshll.u32 %s824_s6, 4  ;;  %s726_s26 = int_to_ptr.vmem [resolvable:$false] %s725_s26 }
  0x41   : > { %s727_s9 = scalar_lea.vmem %s726_s26, 256  ;;  %p728_p8 = scmp.lt.s32.totalorder %s221_s11, %s726_s26 }
  0x42   : > { %p723_p9 = pnand %p721_p2, %p677_p5  ;;  %p729_p7 = scmp.lt.s32.totalorder %s727_s9, %s720_s5 }
  0x44   : > { %p724_p11 = pneg %p723_p9  ;;  %p730_p3 = por %p729_p7, %p728_p8 }
  0x46   : > { %p731_p6 = pnand %p730_p3, %p724_p11 }
  0x48   : > { %734 = shalt.err (!%p731_p6)
}
  0x49   : > { %619 = dma.hbm_to_vmem [thread:$0]  (!%p934_p0), %s979_s8, 128, %s221_s11, %s207_s10  }
  0x4a   : > { %p1098_p13 = scmp.ne.s32.totalorder %s1097_s21, 0 }
  0x4b   : > { %s1006_s12 = sand.u32 (!%p1098_p13), 1, %s805_s16   ;;  %p1099_p8 = scmp.ne.s32.totalorder (!%p1098_p13), %s1091_s27, 0 }
  0x4c   : > { %229 = sbr.rel (%p1098_p13) target bundleno = 324 (0x144), region = 36  ;;  %s1009_s14 = sshll.u32 (!%p1098_p13), %s1006_s12, 3 }
  0x4d   : > { %s232_s22 = scalar_lea.sflag (!%p1098_p13), [#allocation3], %s1006_s12  ;;  %s235_s7 = scalar_lea.vmem (!%p1098_p13), [#allocation2], %s1009_s14 }
  0x53   : > { %788 = dma.done.wait (%p1099_p8), %s232_s22, 128  }
  0x54   : > { %790 = vsyncadd (%p1099_p8), %s232_s22, 4294967168  ;;  %s241_s13 = scalar_lea.sflag [#allocation6], %s1006_s12  ;;  %s244_s21 = scalar_lea.vmem [#allocation5], %s1009_s14 }
  0x55   : > { %792 = dma.done.wait (%p1099_p8), %s241_s13, 128  }
  0x56   : > { %794 = vsyncadd (%p1099_p8), %s241_s13, 4294967168  ;;  %v825_v0 = vmov 0.0   ;;  %v279_v1 = vld [vmem:[%s244_s21] sm:$0xff]  ;;  %v277_v2 = vld [vmem:[%s235_s7] sm:$0xff]  ;;  %vm289_vm0 = vcmask 1043456   ;;  %vm285_vm1 = vcmask 31744  }
  0x57   : > { %358 = vmatprep.mubr.f32.mxu1 %v825_v0  ;;  %438 = vmatprep.mubr.f32.mxu0 %v825_v0  ;;  %v280_v3 = vmax.f32 %v279_v1, 0.0  ;;  %v278_v4 = vmax.f32 %v277_v2, 0.0  ;;  %v282_v7 = vld [vmem:[%s1086_s3] sm:$0xf]  ;;  %s604_s24 = sshll.u32 %s813_s18, 7  ;;  %s273_s25 = scalar_lea.vmem [#allocation7], %s1009_s14 }
  0x58   : > { %v281_v8 = vld [vmem:[%s1085_s2] sm:$0xf]  ;;  %s467_s5 = sshll.u32 %s273_s25, 4  ;;  %s1034_s9 = scalar_lea.hbm %s1087_s4, %s604_s24  ;;  %s1036_s5 = int_to_ptr.vmem [resolvable:$true] %s467_s5 }
  0x59   : > { %v284_v5 = vcombine.high %v280_v3, %v280_v3  ;;  %v366_v6 = vcombine.high %v278_v4, %v278_v4  ;;  %s451_s22 = scalar_lea.sflag [#allocation4], %s1006_s12  ;;  %s735_s7 = scalar_lea.vmem %s1036_s5, 128 }
  0x5a   : > { %p736_p0 = scmp.ne.s32.totalorder %s1036_s5, %s735_s7  ;;  %p1100_p5 = scmp.ne.s32.totalorder %s1092_s28, 0 }
  0x5b   : > { %591 = vmatprep.subr.msk.mxu1 %vm289_vm0, %v284_v5  ;;  %594 = vmatprep.subr.msk.mxu0 %vm289_vm0, %v366_v6  ;;  %s826_s18 = smov [#allocation7]  }
  0x5c   : > { %592 = vmatpush1.msk.msra.mxu1 %vm289_vm0, %v280_v3  ;;  %595 = vmatpush1.msk.msra.mxu0 %vm289_vm0, %v278_v4  ;;  %p737_p7 = pnand %p736_p0, %p1100_p5  ;;  %s739_s14 = sshll.u32 %s826_s18, 4  ;;  %s740_s14 = int_to_ptr.vmem [resolvable:$false] %s739_s14 }
  0x5d   : > { %593 = vmatmul.mubr.msk.f32.vlgmr.msra.gmra.mrb[0].mxu1 %vm285_vm1, %v282_v7  ;;  %596 = vmatmul.mubr.msk.f32.vlgmr.msra.gmra.mrb[0].mxu0 %vm285_vm1, %v281_v8  ;;  %s741_s13 = scalar_lea.vmem %s740_s14, 256  ;;  %p742_p10 = scmp.lt.s32.totalorder %s1036_s5, %s740_s14 }
  0x5e   : > { %p738_p4 = pneg %p737_p7  ;;  %p743_p12 = scmp.lt.s32.totalorder %s741_s13, %s735_s7 }
  0x60   : > { %p744_p1 = por %p743_p12, %p742_p10 }
  0x62   : > { %p745_p2 = pnand %p744_p1, %p738_p4 }
 0x130   : > { %v360_v9 = vpop.f32.mrb[0].mxu1  ;;  %v440_v10 = vpop.f32.mrb[0].mxu0 }
 0x131   : > { %v441_v11 = vadd.f32 %v440_v10, %v360_v9  ;;  %v362_v12 = vpop.f32.mrb[1].mxu1  ;;  %v442_v13 = vpop.f32.mrb[1].mxu0 }
 0x132   : > { %v443_v14 = vadd.f32 %v442_v13, %v362_v12 }
 0x134   : > { %v447_v15 = vcombine.low %v441_v11, %v443_v14 }
 0x136   : > { %449 = vst [vmem:[%s273_s25] sm:$0xff] %v447_v15 }
 0x137   : > { %748 = shalt.err (!%p745_p2)
}
 0x138   : > { %s749_s12 = scalar_lea.hbm %s1034_s9, 128  ;;  %s753_s11 = scalar_lea.hbm %s1087_s4, 256 }
 0x139   : > { %p750_p9 = scmp.ne.s32.totalorder %s1034_s9, %s749_s12  ;;  %p754_p6 = scmp.lt.u32.totalorder %s1034_s9, %s1087_s4 }
 0x13a   : > { %p755_p13 = scmp.lt.u32.totalorder %s753_s11, %s749_s12  ;;  %p757_p0 = scmp.lt.u32.totalorder %s749_s12, %s1034_s9 }
 0x13b   : > { %p751_p11 = pnand %p750_p9, %p1100_p5 }
 0x13c   : > { %p756_p8 = por %p755_p13, %p754_p6 }
 0x13d   : > { %p752_p3 = pneg %p751_p11 }
 0x13e   : > { %p758_p7 = por %p757_p0, %p756_p8 }
 0x140   : > { %p759_p4 = pnand %p758_p7, %p752_p3 }
 0x142   : > { %762 = shalt.err (!%p759_p4)
}
 0x143   : > { %611 = dma.vmem_to_hbm [thread:$0]  (%p1100_p5), %s1036_s5, 128, %s1034_s9, %s451_s22  }
 0x144 PF: > { %s479_s24 = sand.u32 1, %s801_s15   ;;  %p1101_p10 = scmp.ne.s32.totalorder %s1093_s30, 0 }
 0x145   : > { %p1102_p12 = scmp.ge.s32.totalorder %s821_s20, 2  ;;  %s480_s25 = scalar_lea.sflag [#allocation4], %s479_s24 }
 0x147   : > { %p621_p1 = pnand %p1102_p12, %p1101_p10 }
 0x149   : > { %796 = dma.done.wait (!%p621_p1), %s480_s25, 128  }
 0x14a   : > { %798 = vsyncadd (!%p621_p1), %s480_s25, 4294967168  ;;  %s23_s20 = sadd.s32 1, %s821_s20   ;;  %s1103_s15 = smov %s805_s16 }
 0x14b   : > { %p20_p2 = scmp.ge.s32.totalorder %s23_s20, 4   ;;  %s1104_s16 = smov %s809_s17 }
 0x14c   : > { %s1105_s17 = smov %s908_s29  ;;  %s1106_s18 = smov %s817_s19 }
 0x14d   : > { %s1107_s19 = smov %s1109_s23  ;;  %22 = sbr.rel (!%p20_p2) target bundleno = 8 (0x8), region = 94 }
 0x154   :  { %485 = vsyncpa [#allocation3], 1 }
 0x155   :  { %487 = vsyncpa [#allocation3 + $0x1], 1 }
 0x156   :  { %488 = vsyncpa [#allocation6], 1 }
 0x157   :  { %490 = vsyncpa [#allocation6 + $0x1], 1 }
 0x158   :  { %491 = vsyncpa [#allocation4], 1 }
 0x159   :  { %493 = vsyncpa [#allocation4 + $0x1], 1 }

</bundles_post_ra>
